<compile_context>
chip_gen: v5e
topology: v5e:2x2
jax: 0.10.0
libtpu: 0.0.40
codegen_flags: <defaults>
</compile_context>

<pallas_src>
import jax
import jax.numpy as jnp
from jax import lax
from jax.experimental import pallas as pl
from jax.experimental.pallas import tpu as pltpu

LANES = 128
SUBLANES = 8
TILE_BYTES_PER_INPUT = 4 * 1024 * 1024      # per-input, per-buffer tile budget (~4 MiB)
MIN_EFFICIENT_BLOCK_ROWS = 1024             # below this, per-step overhead dominates
VMEM_LIMIT_BYTES = 32 * 1024 * 1024         # 2 inputs x 2 buffers x 4 MiB + temps << 32 MiB
                                            # (legal on v5e/v6e 128 MiB and v7x 64 MiB physical)


def _round_up(a, b):
    return ((a + b - 1) // b) * b


def _largest_aligned_divisor(n, cap, align=SUBLANES):
    """Largest multiple of `align` that divides `n` and is <= cap (n is a multiple of align)."""
    cand = min(cap, n)
    cand -= cand % align
    while cand >= align:
        if n % cand == 0:
            return cand
        cand -= align
    return align


def _pick_unroll(n_iters, max_unroll=8):
    """Unroll factor that exactly divides the (static) trip count."""
    u = min(max_unroll, max(n_iters, 1))
    while u > 1 and n_iters % u:
        u -= 1
    return u


def _num_row_splits():
    """2 row-splits on chips with 2 TensorCores per chip (v7x), else 1."""
    try:
        kind = jax.devices()[0].device_kind.lower()
    except Exception:
        return 1
    if "v7" in kind or "7x" in kind:
        return 2
    return 1


def _jaccard_kernel(x_ref, y_ref, inter_ref, total_ref, acc_inter_ref, acc_total_ref):
    """Accumulate sum(x*y) and sum(x+y) over one (block_rows, 128) tile of a row-split."""
    step = pl.program_id(1)

    @pl.when(step == 0)
    def _():
        acc_inter_ref[...] = jnp.zeros_like(acc_inter_ref)
        acc_total_ref[...] = jnp.zeros_like(acc_total_ref)

    block_rows = x_ref.shape[0]
    n_groups = block_rows // SUBLANES

    # One (8, 128) vreg-group per iteration; the two f32 accumulators live in vregs
    # (fori_loop carry), so the tile's f32 casts / products never hit VMEM.  The only
    # per-tile VMEM traffic beyond the input DMAs is the 2x (8,128) scratch RMW below.
    def body(g, carry):
        acc_i, acc_t = carry
        r = pl.multiple_of(g * SUBLANES, SUBLANES)
        xv = x_ref[pl.ds(r, SUBLANES), :].astype(jnp.float32)
        yv = y_ref[pl.ds(r, SUBLANES), :].astype(jnp.float32)
        return acc_i + xv * yv, acc_t + (xv + yv)

    zeros = jnp.zeros((SUBLANES, LANES), jnp.float32)
    acc_i, acc_t = lax.fori_loop(0, n_groups, body, (zeros, zeros),
                                 unroll=_pick_unroll(n_groups))

    acc_inter_ref[...] += acc_i
    acc_total_ref[...] += acc_t

    @pl.when(step == pl.num_programs(1) - 1)
    def _():
        # Lane-dense (8,128) partial sums; the cross-lane reduce happens in the wrapper.
        inter_ref[...] = acc_inter_ref[...]
        total_ref[...] = acc_total_ref[...]


def jaccard_loss(x, y, eps=1e-6, apply_softmax=False):
    """Pallas implementation of JaccardLoss.forward."""
    if apply_softmax:
        # TODO(synk): fuse the channel softmax into the streaming kernel (or a preceding
        # Pallas kernel) to avoid one extra full HBM read+write of x on this path.
        x = jax.nn.softmax(x, axis=1)

    x_flat = jnp.ravel(x)   # native dtype; cast happens inside the kernel
    y_flat = jnp.ravel(y)
    n = x_flat.shape[0]

    num_splits = _num_row_splits()
    itemsize = max(jnp.dtype(x_flat.dtype).itemsize, jnp.dtype(y_flat.dtype).itemsize)
    max_block_rows = max(
        SUBLANES, (TILE_BYTES_PER_INPUT // (LANES * itemsize)) // SUBLANES * SUBLANES)

    # ---- tiling (all trace-time Python ints) ---------------------------------
    rows = pl.cdiv(n, LANES)
    rows_padded = _round_up(max(rows, 1), num_splits * SUBLANES)
    rows_per_split = rows_padded // num_splits

    block_rows = _largest_aligned_divisor(rows_per_split, max_block_rows)
    if block_rows < MIN_EFFICIENT_BLOCK_ROWS and rows_per_split >= 2 * max_block_rows:
        # Row count with no usable divisor (e.g. 8 * prime): accept one jnp.pad copy so
        # we stream with large tiles instead of thousands of tiny ones (each grid step
        # costs ~0.35us of pipeline overhead).
        block_rows = max_block_rows
        rows_per_split = _round_up(rows_per_split, block_rows)
        rows_padded = rows_per_split * num_splits

    n_padded = rows_padded * LANES
    if n_padded != n:
        # Zero padding is sum-neutral for both x*y and x+y.  For typical shapes
        # (n already a multiple of 128*8*num_splits) this branch is skipped entirely
        # and no extra HBM pass happens.
        x_flat = jnp.pad(x_flat, (0, n_padded - n))
        y_flat = jnp.pad(y_flat, (0, n_padded - n))

    x2 = x_flat.reshape(rows_padded, LANES)   # contiguous reshape: free
    y2 = y_flat.reshape(rows_padded, LANES)

    steps = rows_per_split // block_rows
    grid = (num_splits, steps)
    in_map = lambda s, i: (s * steps + i, 0)
    out_map = lambda s, i: (s, 0)             # resident per-split output block across `i`

    out_rows = num_splits * SUBLANES
    cost = pl.CostEstimate(
        flops=4 * n_padded,
        transcendentals=0,
        bytes_accessed=(n_padded * (jnp.dtype(x_flat.dtype).itemsize
                                    + jnp.dtype(y_flat.dtype).itemsize)
                        + 2 * out_rows * LANES * 4),
    )

    # On 2-TC chips (v7x) the leading axis shards the row range across TensorCores.
    # (If profiling shows it is not actually sharded there, switch to pltpu.CORE_PARALLEL.)
    dim_sem = (pltpu.PARALLEL if num_splits > 1 else pltpu.ARBITRARY, pltpu.ARBITRARY)

    inter_parts, total_parts = pl.pallas_call(
        _jaccard_kernel,
        out_shape=(
            jax.ShapeDtypeStruct((out_rows, LANES), jnp.float32),
            jax.ShapeDtypeStruct((out_rows, LANES), jnp.float32),
        ),
        grid_spec=pltpu.PrefetchScalarGridSpec(
            num_scalar_prefetch=0,
            grid=grid,
            in_specs=[
                pl.BlockSpec((block_rows, LANES), in_map),
                pl.BlockSpec((block_rows, LANES), in_map),
            ],
            out_specs=[
                pl.BlockSpec((SUBLANES, LANES), out_map),
                pl.BlockSpec((SUBLANES, LANES), out_map),
            ],
            scratch_shapes=[
                pltpu.VMEM((SUBLANES, LANES), jnp.float32),
                pltpu.VMEM((SUBLANES, LANES), jnp.float32),
            ],
        ),
        compiler_params=pltpu.CompilerParams(
            dimension_semantics=dim_sem,
            vmem_limit_bytes=VMEM_LIMIT_BYTES,
        ),
        cost_estimate=cost,
    )(x2, y2)

    # Single tiny cross-lane reduction of the lane-dense partials.
    intersection = jnp.sum(inter_parts)
    total = jnp.sum(total_parts)
    union = total - intersection
    iou = (intersection + eps) / (union + eps)
    return 1.0 - iou


def jaccard_loss_ref(x, y, eps=1e-6, apply_softmax=False):
    if apply_softmax:
        x = jax.nn.softmax(x, axis=1)
    xf = jnp.ravel(x).astype(jnp.float32)
    yf = jnp.ravel(y).astype(jnp.float32)
    intersection = jnp.sum(xf * yf)
    total = jnp.sum(xf + yf)
    union = total - intersection
    return 1.0 - (intersection + eps) / (union + eps)


if __name__ == "__main__":
    key = jax.random.PRNGKey(0)
    kx, ky = jax.random.split(key)

    # NCHW-shaped inputs consistent with a segmentation loss: (B, C, H, W)
    x = jax.random.uniform(kx, (2, 4, 16, 16), dtype=jnp.float32)
    y = (jax.random.uniform(ky, (2, 4, 16, 16)) > 0.5).astype(jnp.float32)

    loss = jaccard_loss(x, y)
    jax.block_until_ready(loss)
    ref = jaccard_loss_ref(x, y)
    assert jnp.allclose(loss, ref, rtol=1e-5, atol=1e-6), (loss, ref)

    # Unaligned size (n not a multiple of 128) exercises the sum-neutral pad path.
    x2 = jax.random.uniform(kx, (2, 3, 7, 9), dtype=jnp.float32)
    y2 = (jax.random.uniform(ky, (2, 3, 7, 9)) > 0.5).astype(jnp.float32)
    loss2 = jaccard_loss(x2, y2)
    jax.block_until_ready(loss2)
    ref2 = jaccard_loss_ref(x2, y2)
    assert jnp.allclose(loss2, ref2, rtol=1e-5, atol=1e-6), (loss2, ref2)

    print("KERNEL_OK")
</pallas_src>

<mosaic_0001>
module attributes {stable_mosaic.version = 11 : i64} {
  func.func @_jaccard_kernel(%arg0: i32, %arg1: i32, %arg2: memref<16x128xf32, #tpu.memory_space<vmem>>, %arg3: memref<16x128xf32, #tpu.memory_space<vmem>>, %arg4: memref<8x128xf32, #tpu.memory_space<vmem>>, %arg5: memref<8x128xf32, #tpu.memory_space<vmem>>, %arg6: memref<8x128xf32, #tpu.memory_space<vmem>>, %arg7: memref<8x128xf32, #tpu.memory_space<vmem>>) attributes {dimension_semantics = [#tpu.dimension_semantics<arbitrary>, #tpu.dimension_semantics<arbitrary>], iteration_bounds = array<i64: 1, 1>, scalar_prefetch = 0 : i64, scratch_operands = 2 : i64, tpu.core_type = #tpu.core_type<tc>, window_params = [{transform_indices = @transform_0, window_bounds = array<i64: 16, 128>}, {transform_indices = @transform_1, window_bounds = array<i64: 16, 128>}, {transform_indices = @transform_2, window_bounds = array<i64: 8, 128>}, {transform_indices = @transform_3, window_bounds = array<i64: 8, 128>}]} {
    %c0_i32 = arith.constant 0 : i32
    %0 = arith.cmpi eq, %arg1, %c0_i32 : i32
    %1 = arith.extui %0 : i1 to i32
    %c0_i32_0 = arith.constant 0 : i32
    %2 = arith.cmpi ne, %1, %c0_i32_0 : i32
    scf.if %2 {
      %cst_16 = arith.constant 0.000000e+00 : f32
      %33 = vector.broadcast %cst_16 : f32 to vector<8x128xf32>
      %c0_17 = arith.constant 0 : index
      %c0_18 = arith.constant 0 : index
      %34 = vector.load %arg6[%c0_17, %c0_18] : memref<8x128xf32, #tpu.memory_space<vmem>>, vector<8x128xf32>
      tpu.vector_store %arg6[%c0_17, %c0_18], %33 {strides = array<i32>} : memref<8x128xf32, #tpu.memory_space<vmem>>, vector<8x128xf32>,
      %cst_19 = arith.constant 0.000000e+00 : f32
      %35 = vector.broadcast %cst_19 : f32 to vector<8x128xf32>
      %c0_20 = arith.constant 0 : index
      %c0_21 = arith.constant 0 : index
      %36 = vector.load %arg7[%c0_20, %c0_21] : memref<8x128xf32, #tpu.memory_space<vmem>>, vector<8x128xf32>
      tpu.vector_store %arg7[%c0_20, %c0_21], %35 {strides = array<i32>} : memref<8x128xf32, #tpu.memory_space<vmem>>, vector<8x128xf32>,
    } else {
    }
    %cst = arith.constant 0.000000e+00 : f32
    %3 = vector.broadcast %cst : f32 to vector<8x128xf32>
    %c0_i32_1 = arith.constant 0 : i32
    %c8_i32 = arith.constant 8 : i32
    %4 = arith.muli %c0_i32_1, %c8_i32 : i32
    %5 = tpu.assume_multiple %4, 8 : i32
    %6 = arith.index_cast %5 : i32 to index
    %c0 = arith.constant 0 : index
    %7 = vector.load %arg2[%6, %c0] : memref<16x128xf32, #tpu.memory_space<vmem>>, vector<8x128xf32>
    %8 = arith.index_cast %5 : i32 to index
    %c0_2 = arith.constant 0 : index
    %9 = vector.load %arg3[%8, %c0_2] : memref<16x128xf32, #tpu.memory_space<vmem>>, vector<8x128xf32>
    %10 = arith.mulf %7, %9 : vector<8x128xf32>
    %11 = arith.addf %3, %10 : vector<8x128xf32>
    %12 = arith.addf %7, %9 : vector<8x128xf32>
    %13 = arith.addf %3, %12 : vector<8x128xf32>
    %c1_i32 = arith.constant 1 : i32
    %c8_i32_3 = arith.constant 8 : i32
    %14 = arith.muli %c1_i32, %c8_i32_3 : i32
    %15 = tpu.assume_multiple %14, 8 : i32
    %16 = arith.index_cast %15 : i32 to index
    %c0_4 = arith.constant 0 : index
    %17 = vector.load %arg2[%16, %c0_4] : memref<16x128xf32, #tpu.memory_space<vmem>>, vector<8x128xf32>
    %18 = arith.index_cast %15 : i32 to index
    %c0_5 = arith.constant 0 : index
    %19 = vector.load %arg3[%18, %c0_5] : memref<16x128xf32, #tpu.memory_space<vmem>>, vector<8x128xf32>
    %20 = arith.mulf %17, %19 : vector<8x128xf32>
    %21 = arith.addf %11, %20 : vector<8x128xf32>
    %22 = arith.addf %17, %19 : vector<8x128xf32>
    %23 = arith.addf %13, %22 : vector<8x128xf32>
    %c2_i32 = arith.constant 2 : i32
    %c0_6 = arith.constant 0 : index
    %c0_7 = arith.constant 0 : index
    %24 = vector.load %arg6[%c0_6, %c0_7] : memref<8x128xf32, #tpu.memory_space<vmem>>, vector<8x128xf32>
    %25 = arith.addf %24, %21 : vector<8x128xf32>
    %c0_8 = arith.constant 0 : index
    %c0_9 = arith.constant 0 : index
    %26 = vector.load %arg6[%c0_8, %c0_9] : memref<8x128xf32, #tpu.memory_space<vmem>>, vector<8x128xf32>
    tpu.vector_store %arg6[%c0_8, %c0_9], %25 {strides = array<i32>} : memref<8x128xf32, #tpu.memory_space<vmem>>, vector<8x128xf32>,
    %c0_10 = arith.constant 0 : index
    %c0_11 = arith.constant 0 : index
    %27 = vector.load %arg7[%c0_10, %c0_11] : memref<8x128xf32, #tpu.memory_space<vmem>>, vector<8x128xf32>
    %28 = arith.addf %27, %23 : vector<8x128xf32>
    %c0_12 = arith.constant 0 : index
    %c0_13 = arith.constant 0 : index
    %29 = vector.load %arg7[%c0_12, %c0_13] : memref<8x128xf32, #tpu.memory_space<vmem>>, vector<8x128xf32>
    tpu.vector_store %arg7[%c0_12, %c0_13], %28 {strides = array<i32>} : memref<8x128xf32, #tpu.memory_space<vmem>>, vector<8x128xf32>,
    %c0_i32_14 = arith.constant 0 : i32
    %30 = arith.cmpi eq, %arg1, %c0_i32_14 : i32
    %31 = arith.extui %30 : i1 to i32
    %c0_i32_15 = arith.constant 0 : i32
    %32 = arith.cmpi ne, %31, %c0_i32_15 : i32
    scf.if %32 {
      %c0_16 = arith.constant 0 : index
      %c0_17 = arith.constant 0 : index
      %33 = vector.load %arg6[%c0_16, %c0_17] : memref<8x128xf32, #tpu.memory_space<vmem>>, vector<8x128xf32>
      %c0_18 = arith.constant 0 : index
      %c0_19 = arith.constant 0 : index
      %34 = vector.load %arg4[%c0_18, %c0_19] : memref<8x128xf32, #tpu.memory_space<vmem>>, vector<8x128xf32>
      tpu.vector_store %arg4[%c0_18, %c0_19], %33 {strides = array<i32>} : memref<8x128xf32, #tpu.memory_space<vmem>>, vector<8x128xf32>,
      %c0_20 = arith.constant 0 : index
      %c0_21 = arith.constant 0 : index
      %35 = vector.load %arg7[%c0_20, %c0_21] : memref<8x128xf32, #tpu.memory_space<vmem>>, vector<8x128xf32>
      %c0_22 = arith.constant 0 : index
      %c0_23 = arith.constant 0 : index
      %36 = vector.load %arg5[%c0_22, %c0_23] : memref<8x128xf32, #tpu.memory_space<vmem>>, vector<8x128xf32>
      tpu.vector_store %arg5[%c0_22, %c0_23], %35 {strides = array<i32>} : memref<8x128xf32, #tpu.memory_space<vmem>>, vector<8x128xf32>,
    } else {
    }
    return
  }
  func.func @transform_0(%arg0: i32, %arg1: i32) -> (i32, i32) {
    %c1_i32 = arith.constant 1 : i32
    %0 = arith.muli %arg0, %c1_i32 : i32
    %1 = arith.addi %0, %arg1 : i32
    %c0_i32 = arith.constant 0 : i32
    %c0_i32_0 = arith.constant 0 : i32
    return %1, %c0_i32 : i32, i32
  }
  func.func @transform_1(%arg0: i32, %arg1: i32) -> (i32, i32) {
    %c1_i32 = arith.constant 1 : i32
    %0 = arith.muli %arg0, %c1_i32 : i32
    %1 = arith.addi %0, %arg1 : i32
    %c0_i32 = arith.constant 0 : i32
    %c0_i32_0 = arith.constant 0 : i32
    return %1, %c0_i32 : i32, i32
  }
  func.func @transform_2(%arg0: i32, %arg1: i32) -> (i32, i32) {
    %c0_i32 = arith.constant 0 : i32
    %c0_i32_0 = arith.constant 0 : i32
    return %arg0, %c0_i32 : i32, i32
  }
  func.func @transform_3(%arg0: i32, %arg1: i32) -> (i32, i32) {
    %c0_i32 = arith.constant 0 : i32
    %c0_i32_0 = arith.constant 0 : i32
    return %arg0, %c0_i32 : i32, i32
  }
}

</mosaic_0001>

<bundles_post_ra>
// kernel: tpu_custom_call.1
= control target key start
LH: loop header
LB: loop body
LE: loop exit
PB: predicated region body
PF: predicated region fallthrough
CT: control target
= control target key end

     0   :  { %9 = vsyncpa [#allocation5], 0  ;;  %s274_s0 = inlined_call_operand.hbm [shape: f32[16,128], index: 0, kind: input, shape index: {}]   ;;  %s275_s1 = inlined_call_operand.hbm [shape: f32[16,128], index: 1, kind: input, shape index: {}]   ;;  %s276_s2 = inlined_call_operand.hbm [shape: f32[8,128], index: 2, kind: output, shape index: {0}]   ;;  %s277_s3 = inlined_call_operand.hbm [shape: f32[8,128], index: 3, kind: output, shape index: {1}]  }
   0x1   :  { %10 = vsyncpa [#allocation8], 0 }
   0x2   :  { %11 = vsyncpa [#allocation6], 0 }
   0x3   :  { %12 = vsyncpa [#allocation11], 0  ;;  %s21_s14 = sshll.u32 %s274_s0, 4  ;;  %s236_s15 = smov [#allocation4]   ;;  %s22_s14 = int_to_ptr.hbm [resolvable:$true] %s21_s14 }
   0x4   :  { %s23_s16 = sshll.u32 %s236_s15, 4  ;;  %s38_s19 = sshll.u32 %s275_s1, 4  ;;  %s24_s16 = int_to_ptr.vmem [resolvable:$true] %s23_s16  ;;  %s39_s19 = int_to_ptr.hbm [resolvable:$true] %s38_s19 }
   0x5   :  { %s237_s20 = smov 128   ;;  %s238_s21 = smov 8  }
   0x6   :  { %29 = dma.hbm_to_vmem [thread:$0]  %s22_s14, 256, %s24_s16, [#allocation5], %s237_s20, %s237_s20, %s238_s21  }
   0x7   :  { %s239_s22 = smov [#allocation7]  }
   0x8   :  { %s40_s23 = sshll.u32 %s239_s22, 4  ;;  %s41_s23 = int_to_ptr.vmem [resolvable:$true] %s40_s23 }
   0x9   :  { %46 = dma.hbm_to_vmem [thread:$0]  %s39_s19, 256, %s41_s23, [#allocation8], %s237_s20, %s237_s20, %s238_s21  }
   0xa   :  { %228 = dma.done.wait [#allocation5], 256  }
   0xb   :  { %229 = vsyncadd [#allocation5], 4294967040 }
   0xc   :  { %230 = dma.done.wait [#allocation8], 256  }
   0xd   :  { %231 = vsyncadd [#allocation8], 4294967040  ;;  %v65_v0 = vld [vmem:[#allocation4] sm:$0xff]  ;;  %v66_v1 = vld [vmem:[#allocation7] sm:$0xff]  ;;  %s240_s0 = smov [#allocation9]   ;;  %s99_s26 = sshll.u32 %s276_s2, 4  ;;  %s100_s26 = int_to_ptr.hbm [resolvable:$true] %s99_s26 }
   0xe   :  { %v72_v2 = vld [vmem:[#allocation4 + $0x8] sm:$0xff]  ;;  %v67_v3 = vmul.f32 %v66_v1, %v65_v0  ;;  %v74_v4 = vld [vmem:[#allocation7 + $0x8] sm:$0xff]  ;;  %v69_v5 = vadd.f32 %v66_v1, %v65_v0  ;;  %s97_s1 = sshll.u32 %s240_s0, 4  ;;  %s241_s27 = smov [#allocation10]   ;;  %s98_s1 = int_to_ptr.vmem [resolvable:$true] %s97_s1 }
   0xf   :  { %v75_v6 = vmul.f32 %v74_v4, %v72_v2  ;;  %v77_v7 = vadd.f32 %v74_v4, %v72_v2  ;;  %s108_s28 = sshll.u32 %s241_s27, 4  ;;  %s110_s4 = sshll.u32 %s277_s3, 4  ;;  %s109_s28 = int_to_ptr.vmem [resolvable:$true] %s108_s28  ;;  %s111_s4 = int_to_ptr.hbm [resolvable:$true] %s110_s4 }
  0x11   :  { %v76_v8 = vadd.f32 %v75_v6, %v67_v3  ;;  %v78_v9 = vadd.f32 %v77_v7, %v69_v5 }
  0x13   :  { %89 = vst [vmem:[#allocation9] sm:$0xff] %v76_v8 }
  0x14   :  { %91 = vst [vmem:[#allocation10] sm:$0xff] %v78_v9  ;;  %102 = dma.vmem_to_hbm [thread:$0]  %s98_s1, 128, %s100_s26, [#allocation6]  }
  0x15   :  { %113 = dma.vmem_to_hbm [thread:$0]  %s109_s28, 128, %s111_s4, [#allocation11]  }
  0x16   :  { %232 = dma.done.wait [#allocation6], 128  }
  0x17   :  { %233 = vsyncadd [#allocation6], 4294967168 }
  0x18   :  { %234 = dma.done.wait [#allocation11], 128  }
  0x19   :  { %235 = vsyncadd [#allocation11], 4294967168 }
  0x1a   :  { %122 = vsyncpa [#allocation5], 1 }
  0x1b   :  { %123 = vsyncpa [#allocation8], 1 }
  0x1c   :  { %124 = vsyncpa [#allocation6], 1 }
  0x1d   :  { %125 = vsyncpa [#allocation11], 1 }

</bundles_post_ra>
